<compile_context>
chip_gen: v7x
topology: tpu7x:2x2x1
jax: 0.10.0
libtpu: 0.0.40
codegen_flags: <defaults>
</compile_context>

<pallas_src>
import functools

import jax
import jax.numpy as jnp
from jax.experimental import pallas as pl
from jax.experimental.pallas import tpu as pltpu


_NEG_LARGE = -1e30  # finite "minus infinity" used for init and vocab padding


def _round_up(x, m):
    return (x + m - 1) // m * m


def _fused_kernel(x_ref, w_ref, b_ref, o_ref, logits_ref, m_ref, l_ref, *, nv):
    """Fused projection + log_softmax for one row tile.

    Grid axis 1 has extent 2*nv:
      j <  nv : phase 1 -- matmul one vocab tile, stash the fp32/bf16 logits in
                the resident VMEM scratch, update running max / sum-exp.
      j >= nv : phase 2 -- read stashed logits tile (j - nv), subtract the
                per-row logsumexp, emit a lane-dense (tm, tn) output tile.
    """
    j = pl.program_id(1)

    @pl.when(j == 0)
    def _():
        m_ref[...] = jnp.full_like(m_ref, _NEG_LARGE)
        l_ref[...] = jnp.zeros_like(l_ref)

    @pl.when(j < nv)
    def _phase1():
        # bf16 x bf16 -> fp32 accumulation on the MXU (single matmul overall).
        logits = jnp.dot(x_ref[...], w_ref[...],
                         preferred_element_type=jnp.float32)
        logits = logits + b_ref[...]                       # (TM, TN) fp32
        logits_ref[j] = logits.astype(logits_ref.dtype)    # keep tile resident

        m_prev = m_ref[...]
        m_new = jnp.maximum(m_prev, jnp.max(logits, axis=-1, keepdims=True))
        l_ref[...] = (l_ref[...] * jnp.exp(m_prev - m_new)
                      + jnp.sum(jnp.exp(logits - m_new), axis=-1, keepdims=True))
        m_ref[...] = m_new

    @pl.when(j >= nv)
    def _phase2():
        lse = m_ref[...] + jnp.log(l_ref[...])             # (TM, 1), cheap
        logits = logits_ref[j - nv].astype(jnp.float32)
        o_ref[...] = (logits - lse).astype(o_ref.dtype)


def prepare_generator_weights(w, b, *, tn=512):
    """One-time prep (do at init, NOT per call): bf16 cast + padding of W / b.

    w: (d_model, vocab) -> (d_pad, v_pad) bf16 with d_pad = round_up(d, 256)
    (MXU K-dim alignment on v6e/v7x) and v_pad = round_up(vocab, tn_eff).
    b: (vocab,) -> (1, v_pad) fp32; padded vocab columns get a huge negative
    bias so they never influence max / sum-exp.  This is safe because the
    padding is always < tn_eff columns, so every vocab tile contains at least
    one real column (l can never be 0).
    """
    d_model, vocab = w.shape
    d_pad = _round_up(d_model, 256)
    tn_eff = min(tn, _round_up(vocab, 128))
    v_pad = _round_up(vocab, tn_eff)

    wc = w.astype(jnp.bfloat16)
    bc = b.astype(jnp.float32)
    if d_pad != d_model or v_pad != vocab:
        wc = jnp.pad(wc, ((0, d_pad - d_model), (0, v_pad - vocab)))
    if v_pad != vocab:
        bc = jnp.pad(bc, (0, v_pad - vocab), constant_values=_NEG_LARGE)
    return wc, bc.reshape(1, v_pad)


@functools.partial(jax.jit, static_argnames=("vocab", "tm", "tn", "out_dtype"))
def generator_forward(x, w_p, b_p, *, vocab, tm=256, tn=512,
                      out_dtype=jnp.bfloat16):
    """log_softmax(x @ W + b, axis=-1) with pre-prepared (bf16, padded) W / b.

    x: (batch, seq, d_model).  w_p, b_p from prepare_generator_weights (same tn).
    Returns (batch, seq, vocab) log-probabilities in out_dtype (default bf16:
    halves HBM writeback on the bandwidth-poor v5e/v6e).
    """
    batch, seq, d_model = x.shape
    d_pad, v_pad = w_p.shape
    n = batch * seq
    out_bytes = jnp.dtype(out_dtype).itemsize

    tn_eff = min(tn, _round_up(vocab, 128))
    assert v_pad == _round_up(vocab, tn_eff) and v_pad % tn_eff == 0, \
        "w_p / b_p were prepared with a different tn"
    assert d_pad >= d_model
    nv = v_pad // tn_eff

    # Row tile: bf16-native multiple of 16.  On multi-TC chips (v7x) keep at
    # least 2 row tiles when there is enough work so both cores get a share of
    # the "parallel" row axis.
    tm_eff = min(tm, _round_up(n, 16))
    if _round_up(n, tm_eff) // tm_eff < 2 and n >= 256:
        tm_eff = max(128, _round_up((n + 1) // 2, 128))

    # Exact VMEM accounting: double-buffered tiles + resident logits scratch.
    # Budget chosen to be safe even on v7x's 64 MiB VMEM per TensorCore.
    budget = 40 * 1024 * 1024

    def _need(tm_c, scratch_dt):
        tiles = (2 * tm_c * d_pad * 2              # x tile (bf16), 2x buffered
                 + 2 * d_pad * tn_eff * 2          # w tile (bf16), 2x buffered
                 + 2 * tn_eff * 4                  # bias tile (fp32)
                 + 2 * tm_c * tn_eff * out_bytes   # output tile, 2x buffered
                 + 2 * tm_c * 4)                   # m / l accumulators
        return tiles + tm_c * v_pad * jnp.dtype(scratch_dt).itemsize

    candidates = [(tm_eff, jnp.float32), (tm_eff, jnp.bfloat16)]
    t = tm_eff
    while t > 128:
        t = max(128, t // 2)
        candidates.append((t, jnp.bfloat16))
    tm_eff, scratch_dtype = candidates[-1]
    for tm_c, sdt in candidates:
        if _need(tm_c, sdt) <= budget:
            tm_eff, scratch_dtype = tm_c, sdt
            break

    n_pad = _round_up(n, tm_eff)
    need = _need(tm_eff, scratch_dtype)
    vmem_limit = int(min(max(need + 8 * 1024 * 1024, 16 * 1024 * 1024),
                         48 * 1024 * 1024))

    # Per-call x prep is cheap (n x d_model); weight prep is hoisted to init.
    x2 = x.reshape(n, d_model).astype(jnp.bfloat16)
    if n_pad != n or d_pad != d_model:
        x2 = jnp.pad(x2, ((0, n_pad - n), (0, d_pad - d_model)))

    grid = (n_pad // tm_eff, 2 * nv)

    x_spec = pl.BlockSpec((tm_eff, d_pad), lambda i, j: (i, 0))
    # Phase 2 pins the w / b index at the last vocab tile -> no re-fetch.
    w_spec = pl.BlockSpec((d_pad, tn_eff),
                          lambda i, j: (0, jnp.minimum(j, nv - 1)))
    b_spec = pl.BlockSpec((1, tn_eff),
                          lambda i, j: (0, jnp.minimum(j, nv - 1)))
    # Phase 1 pins the output index at vocab tile 0 (never written there);
    # phase 2 walks the lane-dense output tiles.
    o_spec = pl.BlockSpec((tm_eff, tn_eff),
                          lambda i, j: (i, jnp.maximum(j - nv, 0)))

    flops = 2 * n_pad * d_pad * v_pad               # matmul done exactly once
    w_stream = (n_pad // tm_eff) * (d_pad * v_pad * 2 + v_pad * 4)
    bytes_accessed = (n_pad * d_pad * 2             # x read
                      + w_stream                    # w/b re-read per row tile
                      + n_pad * v_pad * out_bytes)  # output writeback

    out2 = pl.pallas_call(
        functools.partial(_fused_kernel, nv=nv),
        out_shape=jax.ShapeDtypeStruct((n_pad, v_pad), out_dtype),
        grid_spec=pltpu.PrefetchScalarGridSpec(
            num_scalar_prefetch=0,
            grid=grid,
            in_specs=[x_spec, w_spec, b_spec],
            out_specs=o_spec,
            scratch_shapes=[
                pltpu.VMEM((nv, tm_eff, tn_eff), scratch_dtype),  # logits
                pltpu.VMEM((tm_eff, 1), jnp.float32),             # running max
                pltpu.VMEM((tm_eff, 1), jnp.float32),             # running sum
            ],
        ),
        compiler_params=pltpu.CompilerParams(
            dimension_semantics=("parallel", "arbitrary"),
            vmem_limit_bytes=vmem_limit,
        ),
        cost_estimate=pl.CostEstimate(
            flops=flops,
            transcendentals=n_pad * v_pad + 2 * n_pad,
            bytes_accessed=bytes_accessed,
        ),
    )(x2, w_p, b_p)

    out2 = out2[:n, :vocab]
    return out2.reshape(batch, seq, vocab)


def reference_forward(x, w, b):
    # Mirror the kernel's bf16 rounding of the matmul inputs (fp32 accumulate).
    xf = x.astype(jnp.bfloat16).astype(jnp.float32)
    wf = w.astype(jnp.bfloat16).astype(jnp.float32)
    logits = jnp.einsum("bsd,dv->bsv", xf, wf) + b
    return jax.nn.log_softmax(logits, axis=-1)


if __name__ == "__main__":
    # Small shapes consistent with the module: d_model hidden, vocab output.
    batch, seq, d_model, vocab = 2, 8, 32, 128

    key = jax.random.PRNGKey(0)
    kx, kw, kb = jax.random.split(key, 3)

    # Deterministic init (mimics nn.Linear uniform bound 1/sqrt(d_model)).
    bound = 1.0 / (d_model ** 0.5)
    w = jax.random.uniform(kw, (d_model, vocab), jnp.float32, -bound, bound)
    b = jax.random.uniform(kb, (vocab,), jnp.float32, -bound, bound)
    x = jax.random.normal(kx, (batch, seq, d_model), jnp.float32)

    # Weight prep happens ONCE here (not inside the per-call jit path).
    w_p, b_p = prepare_generator_weights(w, b, tn=512)
    w_p, b_p = jax.block_until_ready((w_p, b_p))

    out = generator_forward(x, w_p, b_p, vocab=vocab)
    out = jax.block_until_ready(out)

    ref = reference_forward(x, w, b)
    assert out.shape == (batch, seq, vocab)
    # Output is bf16 by default -> compare with bf16-appropriate tolerance.
    assert bool(jnp.allclose(out.astype(jnp.float32), ref,
                             atol=2e-2, rtol=2e-2)), "mismatch vs reference"

    print("KERNEL_OK")
</pallas_src>

<mosaic_0001>
module attributes {stable_mosaic.version = 11 : i64} {
  func.func @_fused_kernel(%arg0: i32, %arg1: i32, %arg2: memref<16x256xbf16, #tpu.memory_space<vmem>>, %arg3: memref<256x128xbf16, #tpu.memory_space<vmem>>, %arg4: memref<1x128xf32, #tpu.memory_space<vmem>>, %arg5: memref<16x128xbf16, #tpu.memory_space<vmem>>, %arg6: memref<1x16x128xf32, #tpu.memory_space<vmem>>, %arg7: memref<16x1xf32, #tpu.memory_space<vmem>>, %arg8: memref<16x1xf32, #tpu.memory_space<vmem>>) attributes {dimension_semantics = [#tpu.dimension_semantics<parallel>, #tpu.dimension_semantics<arbitrary>], iteration_bounds = array<i64: 1, 2>, scalar_prefetch = 0 : i64, scratch_operands = 3 : i64, tpu.core_type = #tpu.core_type<tc>, window_params = [{transform_indices = @transform_0, window_bounds = array<i64: 16, 256>}, {transform_indices = @transform_1, window_bounds = array<i64: 256, 128>}, {transform_indices = @transform_2, window_bounds = array<i64: 1, 128>}, {transform_indices = @transform_3, window_bounds = array<i64: 16, 128>}]} {
    %c0_i32 = arith.constant 0 : i32
    %0 = arith.cmpi eq, %arg1, %c0_i32 : i32
    %1 = arith.extui %0 : i1 to i32
    %c0_i32_0 = arith.constant 0 : i32
    %2 = arith.cmpi ne, %1, %c0_i32_0 : i32
    scf.if %2 {
      %cst = arith.constant -1.000000e+30 : f32
      %9 = vector.broadcast %cst : f32 to vector<16x1xf32>
      %c0 = arith.constant 0 : index
      %c0_4 = arith.constant 0 : index
      %10 = vector.load %arg7[%c0, %c0_4] : memref<16x1xf32, #tpu.memory_space<vmem>>, vector<16x1xf32>
      tpu.vector_store %arg7[%c0, %c0_4], %9 {strides = array<i32>} : memref<16x1xf32, #tpu.memory_space<vmem>>, vector<16x1xf32>,
      %cst_5 = arith.constant 0.000000e+00 : f32
      %11 = vector.broadcast %cst_5 : f32 to vector<16x1xf32>
      %c0_6 = arith.constant 0 : index
      %c0_7 = arith.constant 0 : index
      %12 = vector.load %arg8[%c0_6, %c0_7] : memref<16x1xf32, #tpu.memory_space<vmem>>, vector<16x1xf32>
      tpu.vector_store %arg8[%c0_6, %c0_7], %11 {strides = array<i32>} : memref<16x1xf32, #tpu.memory_space<vmem>>, vector<16x1xf32>,
    } else {
    }
    %c1_i32 = arith.constant 1 : i32
    %3 = arith.cmpi slt, %arg1, %c1_i32 : i32
    %4 = arith.extui %3 : i1 to i32
    %c0_i32_1 = arith.constant 0 : i32
    %5 = arith.cmpi ne, %4, %c0_i32_1 : i32
    scf.if %5 {
      %c0 = arith.constant 0 : index
      %c0_4 = arith.constant 0 : index
      %9 = vector.load %arg2[%c0, %c0_4] : memref<16x256xbf16, #tpu.memory_space<vmem>>, vector<16x256xbf16>
      %c0_5 = arith.constant 0 : index
      %c0_6 = arith.constant 0 : index
      %10 = vector.load %arg3[%c0_5, %c0_6] : memref<256x128xbf16, #tpu.memory_space<vmem>>, vector<256x128xbf16>
      %cst = arith.constant dense<0.000000e+00> : vector<16x128xf32>
      %11 = tpu.matmul %9, %10, %cst {dimension_numbers = #tpu.dot_dimension_numbers<[1], [0], [0], [1], [0, 0, 1, 1], [], []>} : vector<16x256xbf16>, vector<256x128xbf16>, vector<16x128xf32> -> vector<16x128xf32>
      %c0_7 = arith.constant 0 : index
      %c0_8 = arith.constant 0 : index
      %12 = vector.load %arg4[%c0_7, %c0_8] : memref<1x128xf32, #tpu.memory_space<vmem>>, vector<1x128xf32>
      %13 = vector.broadcast %12 : vector<1x128xf32> to vector<16x128xf32>
      %14 = arith.addf %11, %13 : vector<16x128xf32>
      %15 = arith.index_cast %arg1 : i32 to index
      %c0_9 = arith.constant 0 : index
      %c0_10 = arith.constant 0 : index
      %16 = vector.load %arg6[%15, %c0_9, %c0_10] : memref<1x16x128xf32, #tpu.memory_space<vmem>>, vector<1x16x128xf32>
      %17 = vector.shape_cast %16 : vector<1x16x128xf32> to vector<16x128xf32>
      %18 = vector.shape_cast %14 : vector<16x128xf32> to vector<1x16x128xf32>
      tpu.vector_store %arg6[%15, %c0_9, %c0_10], %18 {strides = array<i32>} : memref<1x16x128xf32, #tpu.memory_space<vmem>>, vector<1x16x128xf32>,
      %c0_11 = arith.constant 0 : index
      %c0_12 = arith.constant 0 : index
      %19 = vector.load %arg7[%c0_11, %c0_12] : memref<16x1xf32, #tpu.memory_space<vmem>>, vector<16x1xf32>
      %cst_13 = arith.constant dense<0xFF800000> : vector<16xf32>
      %20 = vector.multi_reduction <maximumf>, %14, %cst_13 [1] : vector<16x128xf32> to vector<16xf32>
      %21 = vector.shape_cast %20 : vector<16xf32> to vector<16x1xf32>
      %22 = arith.maximumf %19, %21 : vector<16x1xf32>
      %c0_14 = arith.constant 0 : index
      %c0_15 = arith.constant 0 : index
      %23 = vector.load %arg8[%c0_14, %c0_15] : memref<16x1xf32, #tpu.memory_space<vmem>>, vector<16x1xf32>
      %24 = arith.subf %19, %22 : vector<16x1xf32>
      %25 = math.exp %24 : vector<16x1xf32>
      %26 = arith.mulf %23, %25 : vector<16x1xf32>
      %27 = vector.broadcast %22 : vector<16x1xf32> to vector<16x128xf32>
      %28 = arith.subf %14, %27 : vector<16x128xf32>
      %29 = math.exp %28 : vector<16x128xf32>
      %cst_16 = arith.constant dense<0.000000e+00> : vector<16xf32>
      %30 = vector.multi_reduction <add>, %29, %cst_16 [1] : vector<16x128xf32> to vector<16xf32>
      %31 = vector.shape_cast %30 : vector<16xf32> to vector<16x1xf32>
      %32 = arith.addf %26, %31 : vector<16x1xf32>
      %c0_17 = arith.constant 0 : index
      %c0_18 = arith.constant 0 : index
      %33 = vector.load %arg8[%c0_17, %c0_18] : memref<16x1xf32, #tpu.memory_space<vmem>>, vector<16x1xf32>
      tpu.vector_store %arg8[%c0_17, %c0_18], %32 {strides = array<i32>} : memref<16x1xf32, #tpu.memory_space<vmem>>, vector<16x1xf32>,
      %c0_19 = arith.constant 0 : index
      %c0_20 = arith.constant 0 : index
      %34 = vector.load %arg7[%c0_19, %c0_20] : memref<16x1xf32, #tpu.memory_space<vmem>>, vector<16x1xf32>
      tpu.vector_store %arg7[%c0_19, %c0_20], %22 {strides = array<i32>} : memref<16x1xf32, #tpu.memory_space<vmem>>, vector<16x1xf32>,
    } else {
    }
    %c1_i32_2 = arith.constant 1 : i32
    %6 = arith.cmpi sge, %arg1, %c1_i32_2 : i32
    %7 = arith.extui %6 : i1 to i32
    %c0_i32_3 = arith.constant 0 : i32
    %8 = arith.cmpi ne, %7, %c0_i32_3 : i32
    scf.if %8 {
      %c0 = arith.constant 0 : index
      %c0_4 = arith.constant 0 : index
      %9 = vector.load %arg7[%c0, %c0_4] : memref<16x1xf32, #tpu.memory_space<vmem>>, vector<16x1xf32>
      %c0_5 = arith.constant 0 : index
      %c0_6 = arith.constant 0 : index
      %10 = vector.load %arg8[%c0_5, %c0_6] : memref<16x1xf32, #tpu.memory_space<vmem>>, vector<16x1xf32>
      %11 = math.log %10 : vector<16x1xf32>
      %12 = arith.addf %9, %11 : vector<16x1xf32>
      %c1_i32_7 = arith.constant 1 : i32
      %13 = arith.subi %arg1, %c1_i32_7 : i32
      %14 = arith.index_cast %13 : i32 to index
      %c0_8 = arith.constant 0 : index
      %c0_9 = arith.constant 0 : index
      %15 = vector.load %arg6[%14, %c0_8, %c0_9] : memref<1x16x128xf32, #tpu.memory_space<vmem>>, vector<1x16x128xf32>
      %16 = vector.shape_cast %15 : vector<1x16x128xf32> to vector<16x128xf32>
      %17 = vector.broadcast %12 : vector<16x1xf32> to vector<16x128xf32>
      %18 = arith.subf %16, %17 : vector<16x128xf32>
      %19 = arith.truncf %18 : vector<16x128xf32> to vector<16x128xbf16>
      %c0_10 = arith.constant 0 : index
      %c0_11 = arith.constant 0 : index
      %20 = vector.load %arg5[%c0_10, %c0_11] : memref<16x128xbf16, #tpu.memory_space<vmem>>, vector<16x128xbf16>
      tpu.vector_store %arg5[%c0_10, %c0_11], %19 {strides = array<i32>} : memref<16x128xbf16, #tpu.memory_space<vmem>>, vector<16x128xbf16>,
    } else {
    }
    return
  }
  func.func @transform_0(%arg0: i32, %arg1: i32) -> (i32, i32) {
    %c0_i32 = arith.constant 0 : i32
    %c0_i32_0 = arith.constant 0 : i32
    return %arg0, %c0_i32 : i32, i32
  }
  func.func @transform_1(%arg0: i32, %arg1: i32) -> (i32, i32) {
    %c0_i32 = arith.constant 0 : i32
    %0 = arith.minsi %arg1, %c0_i32 : i32
    %c0_i32_0 = arith.constant 0 : i32
    %c0_i32_1 = arith.constant 0 : i32
    return %c0_i32_0, %0 : i32, i32
  }
  func.func @transform_2(%arg0: i32, %arg1: i32) -> (i32, i32) {
    %c0_i32 = arith.constant 0 : i32
    %0 = arith.minsi %arg1, %c0_i32 : i32
    %c0_i32_0 = arith.constant 0 : i32
    %c0_i32_1 = arith.constant 0 : i32
    return %c0_i32_0, %0 : i32, i32
  }
  func.func @transform_3(%arg0: i32, %arg1: i32) -> (i32, i32) {
    %c1_i32 = arith.constant 1 : i32
    %0 = arith.subi %arg1, %c1_i32 : i32
    %c0_i32 = arith.constant 0 : i32
    %1 = arith.maxsi %0, %c0_i32 : i32
    %c0_i32_0 = arith.constant 0 : i32
    return %arg0, %1 : i32, i32
  }
}

</mosaic_0001>

<bundles_post_ra>
// kernel: generator_forward.1
= control target key start
LH: loop header
LB: loop body
LE: loop exit
PB: predicated region body
PF: predicated region fallthrough
CT: control target
= control target key end

     0   :  { %8 = vsyncpa [#allocation6], 0  ;;  %s1265_s0 = inlined_call_operand.vmem [shape: bf16[16,256], index: 0, kind: input, shape index: {}]   ;;  %s1266_s1 = inlined_call_operand.hbm [shape: bf16[256,128], index: 1, kind: input, shape index: {}]   ;;  %s1267_s2 = inlined_call_operand.vmem [shape: f32[1,128], index: 2, kind: input, shape index: {}]   ;;  %s1268_s3 = inlined_call_operand.hbm [shape: bf16[16,128], index: 3, kind: output, shape index: {}]  }
   0x1   :  { %10 = vsyncpa [#allocation6 + $0x1], 0 }
   0x2   :  { %11 = vsyncpa [#allocation7], 0 }
   0x3   :  { %13 = vsyncpa [#allocation7 + $0x1], 0  ;;  %s1060_s12 = smov 0   ;;  %s1062_s13 = smov 0  }
   0x4   :  { %s1064_s14 = smov 0   ;;  %s1066_s15 = smov 0  }
   0x5   :  { %s1068_s16 = smov 0   ;;  %s1070_s17 = smov 0  }
   0x6   :  { %s1072_s18 = smov 0  }
   0x7 LB: > { %s694_s19 = sadd.s32 4294967295, %s1028_s18   ;;  %s695_s20 = sadd.s32 4294967294, %s1028_s18   ;;  %s1028_s18 = sphi %s1072_s18, %s19_s18   ;;  %s1024_s17 = sphi %s1070_s17, %s1285_s17   ;;  %s1020_s16 = sphi %s1068_s16, %s1284_s16   ;;  %s1016_s15 = sphi %s1066_s15, %s1255_s15   ;;  %s1012_s14 = sphi %s1064_s14, %s1283_s14   ;;  %s1008_s13 = sphi %s1062_s13, %s1250_s13   ;;  %s1004_s12 = sphi %s1060_s12, %s1282_s12  }
   0x8   : > { %s28_s21 = sadd.s32 1, %s1024_s17  ;;  %p1000_p1 = scmp.ne.s32.totalorder %s1016_s15, 0 }
   0x9   : > { %p29_p0 = scmp.ge.s32.totalorder %s28_s21, 2  ;;  %p76_p2 = scmp.eq.s32.totalorder %s1028_s18, 0 }
   0xa   : > { %p81_p3 = scmp.ne.s32.totalorder %s1016_s15, %s1012_s14  ;;  %p82_p5 = scmp.eq.s32.totalorder %s694_s19, 0 }
   0xb   : > { %s1287_s21 = smov (%p29_p0, %s28_s21), 0  ;;  %p1101_p4 = por %p1000_p1, %p76_p2 }
   0xc   : > { %p1105_p6 = por %p82_p5, %p81_p3  ;;  %p1001_p7 = scmp.ne.s32.totalorder %s1008_s13, 0 }
   0xd   : > { %p143_p8 = scmp.eq.s32.totalorder %s694_s19, 1  ;;  %p148_p10 = scmp.ne.s32.totalorder %s1008_s13, %s1004_s12 }
   0xe   : > { %s1273_s23 = scalar_select %p1105_p6, 1, 0 }
   0xf   : > { %p1110_p9 = por %p1001_p7, %p143_p8  ;;  %p149_p11 = scmp.eq.s32.totalorder %s695_s20, 1 }
  0x10   : > { %p782_p0 = scmp.lt.s32.totalorder %s1028_s18, 2  ;;  %s1030_s26 = smov [#allocation5]  }
  0x11   : > { %s1274_s24 = scalar_select %p1110_p9, 1, 0 }
  0x12   : > { %p1117_p13 = por %p149_p11, %p148_p10  ;;  %s191_s27 = sshll.u32 %s1030_s26, 4  ;;  %s192_s27 = int_to_ptr.vmem [resolvable:$true] %s191_s27 }
  0x13   : > { %p1124_p1 = pnand %p782_p0, %p1101_p4  ;;  %s898_s4 = scalar_lea.hbm %s1266_s1, 2048 }
  0x14   : > { %s1275_s25 = scalar_select %p1117_p13, 1, 0 }
  0x15   : > { %s1276_s28 = scalar_select %p1124_p1, 1, 0 }
  0x16   : > { %p899_p2 = scmp.ne.s32.totalorder %s1266_s1, %s898_s4  ;;  %p900_p3 = pneg %p1124_p1 }
  0x17   : > { %p905_p8 = scmp.lt.u32.totalorder %s898_s4, %s898_s4  ;;  %p907_p4 = scmp.lt.u32.totalorder %s898_s4, %s1266_s1 }
  0x18   : > { %p901_p5 = pnand %p900_p3, %p899_p2 }
  0x19   : > { %p908_p10 = por %p907_p4, %p905_p8 }
  0x1a   : > { %p902_p7 = pneg %p901_p5 }
  0x1c   : > { %p909_p11 = pnand %p908_p10, %p902_p7 }
  0x1e   : > { %912 = shalt.err (!%p909_p11)
}
  0x1f   : > { %s913_s9 = scalar_lea.vmem %s192_s27, 2048  ;;  %s920_s10 = scalar_lea.vmem %s192_s27, 4096 }
  0x20   : > { %p914_p0 = scmp.ne.s32.totalorder %s192_s27, %s913_s9  ;;  %p921_p9 = scmp.lt.s32.totalorder %s192_s27, %s192_s27 }
  0x21   : > { %p922_p6 = scmp.lt.s32.totalorder %s920_s10, %s913_s9 }
  0x22   : > { %p916_p12 = pnand %p914_p0, %p900_p3 }
  0x23   : > { %p923_p1 = por %p922_p6, %p921_p9 }
  0x24   : > { %p917_p13 = pneg %p916_p12 }
  0x26   : > { %p924_p2 = pnand %p923_p1, %p917_p13 }
  0x28   : > { %927 = shalt.err (!%p924_p2)
}
  0x29   : > { %s1031_s11 = smov 64   ;;  %s1032_s14 = smov 4  }
  0x2a   : > { %p1277_p5 = scmp.ne.s32.totalorder %s1276_s28, 0  ;;  %p703_p7 = scmp.ge.s32.totalorder %s1028_s18, 1 }
  0x2b   : > { %p209_p8 = scmp.lt.s32.totalorder %s1028_s18, 3 }
  0x2c   : > { %777 = dma.hbm_to_vmem [thread:$0]  (!%p1277_p5), %s1266_s1, 2048, %s192_s27, [#allocation6], %s1031_s11, %s1031_s11, %s1032_s14  }
  0x2d   : > { %p210_p3 = pnand %p703_p7, %p209_p8 }
  0x2e   : > { %s215_s22 = sand.u32 (!%p210_p3), 1, %s1016_s15   ;;  %p1278_p6 = scmp.ne.s32.totalorder (!%p210_p3), %s1273_s23, 0 }
  0x2f   : > { %213 = sbr.rel (%p210_p3) target bundleno = 935 (0x3a7), region = 32  ;;  %s704_s26 = sshll.u32 (!%p210_p3), %s215_s22, 7 }
  0x30   : > { %s216_s29 = scalar_lea.sflag (!%p210_p3), [#allocation6], %s215_s22  ;;  %s1147_s30 = scalar_lea.vmem (!%p210_p3), [#allocation5], %s704_s26 }
  0x36   : > { %993 = dma.done.wait (%p1278_p6), %s216_s29, 2048  }
  0x37   : > { %995 = vsyncadd (%p1278_p6), %s216_s29, 4294965248  ;;  %s250_s27 = sand.u32 1, %s1008_s13   ;;  %p262_p9 = scmp.lt.s32.totalorder %s1020_s16, 0 }
  0x38   : > { %s1157_s28 = sshll.u32 %s250_s27, 3  ;;  %p709_p12 = scmp.ne.s32.totalorder %s1020_s16, 0 }
  0x39   : > { %s263_s4 = scalar_select %p262_p9, %s1020_s16, 0 }
  0x3a   : > { %s252_s23 = scalar_lea.vmem [#allocation8], %s1157_s28  ;;  %277 = sbr.rel (%p709_p12) target bundleno = 65 (0x41), region = 40  ;;  %vm278_vm0 = vcmask (!%p709_p12), 7168   ;;  %v1033_v0 = vmov (!%p709_p12), -1e+30   ;;  %v1034_v1 = vmov (!%p709_p12), 0.0  }
  0x3b   : > { %s1289_s4 = smov (!%p262_p9, %s263_s4), 0  ;;  %279 = vst.msk [vmem:[#allocation3] sm:$0xff] (!%p709_p12), %vm278_vm0, %v1033_v0  ;;  %280 = vst.msk [vmem:[#allocation3 + $0x8] sm:$0xff] (!%p709_p12), %vm278_vm0, %v1033_v0 }
  0x3c   : > { %s266_s7 = scalar_lea.vmem %s1267_s2, %s1289_s4  ;;  %281 = vst.msk [vmem:[#allocation4] sm:$0xff] (!%p709_p12), %vm278_vm0, %v1034_v1  ;;  %282 = vst.msk [vmem:[#allocation4 + $0x8] sm:$0xff] (!%p709_p12), %vm278_vm0, %v1034_v1 }
  0x41 PF: > { %p710_p13 = scmp.ge.s32.totalorder %s1020_s16, 1 }
  0x42   : > { %v866_v2 = vld [vmem:[%s1147_s30 + $0x40] sm:$0xff] (!%p710_p13)   ;;  %v868_v4 = vld [vmem:[%s1147_s30 + $0x48] sm:$0xff] (!%p710_p13)   ;;  %v870_v6 = vld [vmem:[%s1147_s30 + $0x50] sm:$0xff] (!%p710_p13)   ;;  %s730_s14 = sshll.u32 (!%p710_p13), %s1020_s16, 4  ;;  %v1035_v29 = vmov (!%p710_p13), 0   ;;  %vm519_vm1 = vcmask (!%p710_p13), 7168  }
  0x43   : > { %286 = sbr.rel (%p710_p13) target bundleno = 752 (0x2f0), region = 44  ;;  %v867_v3 = vld [vmem:[%s1147_s30] sm:$0xff] (!%p710_p13)   ;;  %748 = vmatprep.subr.bf16.mxu0 (!%p710_p13), %v866_v2  ;;  %v869_v5 = vld [vmem:[%s1147_s30 + $0x8] sm:$0xff] (!%p710_p13)   ;;  %v871_v7 = vld [vmem:[%s1147_s30 + $0x10] sm:$0xff] (!%p710_p13)   ;;  %s476_s22 = scalar_lea.vmem (!%p710_p13), [#allocation2], %s730_s14  ;;  %864 = vset.pattern.permute.xlu1 (!%p710_p13), %v1035_v29 }
  0x44   : > { %749 = vmatpush3.bf16.msra.mxu0 (!%p710_p13), %v867_v3  ;;  %v872_v8 = vld [vmem:[%s1147_s30 + $0x58] sm:$0xff] (!%p710_p13)   ;;  %v874_v10 = vld [vmem:[%s1147_s30 + $0x60] sm:$0xff] (!%p710_p13)   ;;  %v876_v12 = vld [vmem:[%s1147_s30 + $0x68] sm:$0xff] (!%p710_p13)   ;;  %865 = vset.pattern.permute.xlu0 (!%p710_p13), %v1035_v29 }
  0x45   : > { %750 = vmatprep.subr.bf16.mxu0 (!%p710_p13), %v868_v4  ;;  %v873_v9 = vld [vmem:[%s1147_s30 + $0x18] sm:$0xff] (!%p710_p13)   ;;  %v875_v11 = vld [vmem:[%s1147_s30 + $0x20] sm:$0xff] (!%p710_p13)   ;;  %v877_v14 = vld [vmem:[%s1147_s30 + $0x28] sm:$0xff] (!%p710_p13)  }
  0x46   : > { %v884_v13 = vld [vmem:[%s1265_s0 + $0x4] ss:$8 sps:$4 sm:$0xff] (!%p710_p13)   ;;  %v882_v19 = vld [vmem:[%s1265_s0] ss:$8 sps:$4 sm:$0xff] (!%p710_p13)   ;;  %v479_v30 = vld [vmem:[#allocation3] sm:$0xff] (!%p710_p13) }
  0x47   : > { %466 = vmatprep.mubr.bf16.mxu0 (!%p710_p13), %v884_v13  ;;  %v878_v15 = vld [vmem:[%s1147_s30 + $0x70] sm:$0xff] (!%p710_p13)   ;;  %v880_v17 = vld [vmem:[%s1147_s30 + $0x78] sm:$0xff] (!%p710_p13)   ;;  %v480_v33 = vld [vmem:[#allocation3 + $0x8] sm:$0xff] (!%p710_p13) }
  0x48   : > { %751 = vmatpush3.bf16.msra.mxu0 (!%p710_p13), %v869_v5  ;;  %v879_v16 = vld [vmem:[%s1147_s30 + $0x30] sm:$0xff] (!%p710_p13)   ;;  %v881_v18 = vld [vmem:[%s1147_s30 + $0x38] sm:$0xff] (!%p710_p13)  }
  0x49   : > { %752 = vmatprep.subr.bf16.mxu0 (!%p710_p13), %v870_v6  ;;  %v711_v21 = vld [vmem:[%s266_s7] ss:$0 sm:$0xff] (!%p710_p13)  ;;  %v488_v53 = vld [vmem:[#allocation4 + $0x8] sm:$0xff] (!%p710_p13) }
  0x4a   : > { %v487_v49 = vld [vmem:[#allocation4] sm:$0xff] }
  0x4c   : > { %753 = vmatpush3.bf16.msra.mxu0 %v871_v7 }
  0x4d   : > { %754 = vmatprep.subr.bf16.mxu0 %v872_v8 }
  0x50   : > { %755 = vmatpush3.bf16.msra.mxu0 %v873_v9 }
  0x51   : > { %756 = vmatprep.subr.bf16.mxu0 %v874_v10 }
  0x54   : > { %757 = vmatpush3.bf16.msra.mxu0 %v875_v11 }
  0x55   : > { %758 = vmatprep.subr.bf16.mxu0 %v876_v12 }
  0x58   : > { %759 = vmatpush3.bf16.msra.mxu0 %v877_v14 }
  0x59   : > { %760 = vmatprep.subr.bf16.mxu0 %v878_v15 }
  0x5c   : > { %761 = vmatpush3.bf16.msra.mxu0 %v879_v16 }
  0x5d   : > { %762 = vmatprep.subr.bf16.mxu0 %v880_v17 }
  0x60   : > { %763 = vmatpush3.bf16.msra.mxu0 %v881_v18 }
  0x63   : > { %467 = vmatmul.mubr.bf16.vlgmr.msra.gmra.mrb[0].mxu0 %v882_v19 }
 0x136   : > { %v764_v20 = vpop.f32.mrb[0].mxu0 }
 0x137   : > { %v765_v22 = vpop.f32.mrb[1].mxu0 }
 0x138   : > { %v766_v23 = vadd.f32 %v765_v22, %v764_v20  ;;  %v767_v24 = vpop.f32.mrb[2].mxu0 }
 0x139   : > { %v768_v25 = vpop.f32.mrb[3].mxu0 }
 0x13a   : > { %v469_v26 = vadd.f32 %v766_v23, %v711_v21  ;;  %v769_v27 = vadd.f32 %v768_v25, %v767_v24 }
 0x13c   : > { %477 = vst [vmem:[%s476_s22] sm:$0xff] %v469_v26  ;;  %v472_v28 = vadd.f32 %v769_v27, %v711_v21  ;;  %481 = vmax.xlane.f32.xlu0 %v469_v26 }
 0x13e   : > { %478 = vst [vmem:[%s476_s22 + $0x8] sm:$0xff] %v472_v28 }
 0x140   : > { %483 = vmax.xlane.f32.xlu0 %v472_v28 }
 0x1c9   : > { %v482_v31 = vpop.xlane.xlu0 %481 }
 0x1ca   : > { %v485_v32 = vmax.f32 %v479_v30, %v482_v31 }
 0x1cc   : > { %v489_v34 = vsub.f32 %v479_v30, %v485_v32  ;;  %522 = vst.msk [vmem:[#allocation3] sm:$0xff] %vm519_vm1, %v485_v32  ;;  %499 = vperm.xlu1 %864, %v485_v32  }
 0x1cd   : > { %v484_v35 = vpop.xlane.xlu0 %483 }
 0x1ce   : > { %v486_v36 = vmax.f32 %v480_v33, %v484_v35  ;;  %v491_v46 = vmul.f32 1.442695, %v489_v34 }
 0x1d0   : > { %v490_v37 = vsub.f32 %v480_v33, %v486_v36  ;;  %523 = vst.msk [vmem:[#allocation3 + $0x8] sm:$0xff] %vm519_vm1, %v486_v36  ;;  %504 = vperm.xlu1 %864, %v486_v36  }
 0x1d2   : > { %v493_v47 = vmul.f32 1.442695, %v490_v37 }
 0x24b   : > { %v500_v38 = vpop.permute.xlu1 %499 }
 0x24c   : > { %v507_v39 = vsub.f32 %v469_v26, %v500_v38 }
 0x24e   : > { %v509_v40 = vmul.f32 1.442695, %v507_v39 }
 0x24f   : > { %v505_v41 = vpop.permute.xlu1 %504 }
 0x250   : > { %885 = vpow2.f32 %v509_v40  ;;  %v508_v42 = vsub.f32 %v472_v28, %v505_v41 }
 0x252   : > { %v511_v43 = vmul.f32 1.442695, %v508_v42 }
 0x254   : > { %887 = vpow2.f32 %v511_v43 }
 0x255   : > { %889 = vpow2.f32 %v491_v46 }
 0x256   : > { %891 = vpow2.f32 %v493_v47 }
 0x25a   : > { %v886_v44 = vpop.eup %885 }
 0x25b   : > { %513 = vadd.xlane.f32.xlu0 %v886_v44 }
 0x25e   : > { %v888_v45 = vpop.eup %887 }
 0x25f   : > { %515 = vadd.xlane.f32.xlu1 %v888_v45  ;;  %v890_v48 = vpop.eup %889 }
 0x260   : > { %v495_v50 = vmul.f32 %v890_v48, %v487_v49  ;;  %v892_v51 = vpop.eup %891 }
 0x261   : > { %v496_v55 = vmul.f32 %v892_v51, %v488_v53 }
 0x2e8   : > { %v514_v52 = vpop.xlane.xlu0 %513 }
 0x2e9   : > { %v517_v54 = vadd.f32 %v514_v52, %v495_v50 }
 0x2eb   : > { %520 = vst.msk [vmem:[#allocation4] sm:$0xff] %vm519_vm1, %v517_v54 }
 0x2ec   : > { %v516_v56 = vpop.xlane.xlu1 %515 }
 0x2ed   : > { %v518_v57 = vadd.f32 %v516_v56, %v496_v55 }
 0x2ef   : > { %521 = vst.msk [vmem:[#allocation4 + $0x8] sm:$0xff] %vm519_vm1, %v518_v57 }
 0x2f0 PF: > { %p731_p1 = scmp.lt.s32.totalorder %s1020_s16, 1 }
 0x2f1   : > { %v1036_v59 = vmov (!%p731_p1), 0   ;;  %v528_v62 = vld [vmem:[#allocation3] sm:$0xff] (!%p731_p1)  ;;  %v529_v1 = vld [vmem:[#allocation3 + $0x8] sm:$0xff] (!%p731_p1)  ;;  %s732_s26 = sadd.s32 (!%p731_p1), 4294967295, %s1020_s16 }
 0x2f2   : > { %527 = sbr.rel (%p731_p1) target bundleno = 907 (0x38b), region = 48  ;;  %v530_v58 = vld [vmem:[#allocation4] sm:$0xff] (!%p731_p1)  ;;  %893 = vset.pattern.permute.xlu0 (!%p731_p1), %v1036_v59  ;;  %s733_s29 = sshll.u32 (!%p731_p1), %s732_s26, 4 }
 0x2f3   : > { %894 = vlog2.f32 (!%p731_p1), %v530_v58  ;;  %s540_s30 = scalar_lea.vmem (!%p731_p1), [#allocation2], %s733_s29 }
 0x2f4   : > { %v541_v6 = vld [vmem:[%s540_s30] sm:$0xff] (!%p731_p1)  ;;  %v542_v7 = vld [vmem:[%s540_s30 + $0x8] sm:$0xff] (!%p731_p1) }
 0x2f6   : > { %v531_v60 = vld [vmem:[#allocation4 + $0x8] sm:$0xff] (!%p731_p1) }
 0x2f7   : > { %896 = vlog2.f32 (!%p731_p1), %v531_v60 }
 0x2fd   : > { %v895_v61 = vpop.eup %894 }
 0x2fe   : > { %v533_v0 = vmul.f32 0.6931472, %v895_v61 }
 0x300   : > { %v536_v3 = vadd.f32 %v533_v0, %v528_v62 }
 0x301   : > { %v897_v63 = vpop.eup %896 }
 0x302   : > { %v535_v2 = vmul.f32 0.6931472, %v897_v63  ;;  %545 = vperm.xlu0 %893, %v536_v3  }
 0x304   : > { %v537_v4 = vadd.f32 %v535_v2, %v529_v1 }
 0x306   : > { %550 = vperm.xlu0 %893, %v537_v4  }
 0x381   : > { %v546_v5 = vpop.permute.xlu0 %545 }
 0x382   : > { %v553_v9 = vsub.f32 %v541_v6, %v546_v5 }
 0x385   : > { %v551_v8 = vpop.permute.xlu0 %550 }
 0x386   : > { %v554_v10 = vsub.f32 %v542_v7, %v551_v8 }
 0x388   : > { %v746_v11 = vpack.c.bf16 %v554_v10, %v553_v9 }
 0x38a   : > { %747 = vst [vmem:[%s252_s23] sm:$0xff] %v746_v11  }
 0x38b PF: > { %s737_s4 = sadd.s32 4294967295, %s1020_s16  ;;  %s583_s5 = sshll.u32 %s252_s23, 4  ;;  %s1208_s5 = int_to_ptr.vmem [resolvable:$true] %s583_s5 }
 0x38c   : > { %p574_p4 = scmp.gt.s32.totalorder %s737_s4, 0  ;;  %s1217_s10 = scalar_lea.sflag [#allocation7], %s250_s27 }
 0x38d   : > { %s928_s11 = scalar_lea.vmem %s1208_s5, 128  ;;  %p1279_p11 = scmp.ne.s32.totalorder %s1274_s24, 0 }
 0x38e   : > { %s1291_s4 = smov (!%p574_p4, %s737_s4), 0  ;;  %p929_p10 = scmp.ne.s32.totalorder %s1208_s5, %s928_s11 }
 0x38f   : > { %s738_s6 = sshll.u32 %s1291_s4, 6  ;;  %s1037_s16 = smov [#allocation8]  }
 0x390   : > { %s1213_s9 = scalar_lea.hbm %s1268_s3, %s738_s6  ;;  %p930_p0 = pnand %p929_p10, %p1279_p11 }
 0x391   : > { %s932_s28 = sshll.u32 %s1037_s16, 4  ;;  %s933_s28 = int_to_ptr.vmem [resolvable:$false] %s932_s28 }
 0x392   : > { %p931_p2 = pneg %p930_p0  ;;  %s934_s23 = scalar_lea.vmem %s933_s28, 256 }
 0x393   : > { %p935_p5 = scmp.lt.s32.totalorder %s1208_s5, %s933_s28  ;;  %p936_p7 = scmp.lt.s32.totalorder %s934_s23, %s928_s11 }
 0x395   : > { %p937_p8 = por %p936_p7, %p935_p5 }
 0x397   : > { %p938_p3 = pnand %p937_p8, %p931_p2 }
 0x399   : > { %941 = shalt.err (!%p938_p3)
}
 0x39a   : > { %s942_s27 = scalar_lea.hbm %s1213_s9, 128  ;;  %s946_s20 = scalar_lea.hbm %s1268_s3, 128 }
 0x39b   : > { %p943_p6 = scmp.ne.s32.totalorder %s1213_s9, %s942_s27  ;;  %p947_p13 = scmp.lt.u32.totalorder %s1213_s9, %s1268_s3 }
 0x39c   : > { %p948_p1 = scmp.lt.u32.totalorder %s946_s20, %s942_s27  ;;  %p950_p10 = scmp.lt.u32.totalorder %s942_s27, %s1213_s9 }
 0x39d   : > { %p944_p9 = pnand %p943_p6, %p1279_p11 }
 0x39e   : > { %p949_p4 = por %p948_p1, %p947_p13 }
 0x39f   : > { %p945_p12 = pneg %p944_p9 }
 0x3a0   : > { %p951_p0 = por %p950_p10, %p949_p4 }
 0x3a2   : > { %p952_p2 = pnand %p951_p0, %p945_p12 }
 0x3a4   : > { %955 = shalt.err (!%p952_p2)
}
 0x3a5   : > { %s1038_s29 = smov 64   ;;  %s1039_s30 = smov 4  }
 0x3a6   : > { %772 = dma.vmem_to_hbm [thread:$0]  (%p1279_p11), %s1208_s5, 128, %s1213_s9, %s1217_s10, %s1038_s29, %s1038_s29, %s1039_s30  }
 0x3a7 PF: > { %s598_s4 = sand.u32 1, %s1004_s12   ;;  %p1280_p5 = scmp.ne.s32.totalorder %s1275_s25, 0 }
 0x3a8   : > { %p1281_p7 = scmp.ge.s32.totalorder %s1028_s18, 2  ;;  %s599_s6 = scalar_lea.sflag [#allocation7], %s598_s4 }
 0x3aa   : > { %p779_p8 = pnand %p1281_p7, %p1280_p5 }
 0x3ac   : > { %997 = dma.done.wait (!%p779_p8), %s599_s6, 128  }
 0x3ad   : > { %999 = vsyncadd (!%p779_p8), %s599_s6, 4294967168  ;;  %s19_s18 = sadd.s32 1, %s1028_s18   ;;  %s1282_s12 = smov %s1008_s13 }
 0x3ae   : > { %p16_p3 = scmp.ge.s32.totalorder %s19_s18, 4   ;;  %s1250_s13 = smov 0  }
 0x3af   : > { %s1283_s14 = smov %s1016_s15  ;;  %s1255_s15 = smov 0  }
 0x3b0   : > { %s1284_s16 = smov %s1024_s17  ;;  %s1285_s17 = smov %s1287_s21 }
 0x3b1   :  { %18 = sbr.rel (!%p16_p3) target bundleno = 7 (0x7), region = 97 }
 0x3b8   :  { %604 = vsyncpa [#allocation6], 1 }
 0x3b9   :  { %606 = vsyncpa [#allocation6 + $0x1], 1 }
 0x3ba   :  { %607 = vsyncpa [#allocation7], 1 }
 0x3bb   :  { %609 = vsyncpa [#allocation7 + $0x1], 1 }

</bundles_post_ra>
